<compile_context>
chip_gen: v5e
topology: v5e:2x2
jax: 0.10.0
libtpu: 0.0.40
codegen_flags: <defaults>
</compile_context>

<pallas_src>
import jax
import jax.numpy as jnp
from jax import lax
from jax.experimental import pallas as pl
from jax.experimental.pallas import tpu as pltpu

NUM_DIHEDRALS = 3
ALPHABET_SIZE = 60   # fixed by `torch.reshape(linear, [-1, 60])` in the reference
TRIG_ROWS = 8        # 2*NUM_DIHEDRALS rounded up to a full sublane group


def _round_up(v, m):
    return ((v + m - 1) // m) * m


def dihedral_kernel(x_ref, w_ref, b_ref, trig_ref, yx_ref):
    # x_ref:    (TM, V)   row tile of the flattened internal representation
    # w_ref:    (V, A)    transposed Linear weight (full, VMEM resident)
    # b_ref:    (1, A)    Linear bias (full)
    # trig_ref: (8, A)    rows 0..2 = sin(alphabet).T, rows 3..5 = cos(alphabet).T,
    #                     rows 6..7 = zero padding (sublane alignment)
    # yx_ref:   (8, TM)   lane-dense transposed output [y.T ; x.T ; pad]
    logits = jnp.dot(x_ref[...], w_ref[...],
                     preferred_element_type=jnp.float32) + b_ref[...]

    # Numerically-stable *unnormalized* softmax: atan2(y, x) is invariant under
    # a common positive per-row scale, so the softmax denominator cancels —
    # skip the cross-lane sum + divide, keep only the max-subtraction.
    m = jnp.max(logits, axis=-1, keepdims=True)
    e = jnp.exp(logits - m)                                   # (TM, A)

    # (8, A) contracted with (TM, A) on the alphabet axis -> (8, TM): the
    # result is already transposed (lane-dense TM last dim) without
    # materializing a transpose of `e`.
    yx_ref[...] = lax.dot_general(
        trig_ref[...], e,
        dimension_numbers=(((1,), (1,)), ((), ())),
        preferred_element_type=jnp.float32)


def dihedral_forward(internal_representation, alphabet, weight, bias, *,
                     cast_to_bf16=False):
    """weight: [A, V] (PyTorch Linear layout), bias: [A], alphabet: [A, 3]."""
    B, S, V = internal_representation.shape
    A, D = alphabet.shape
    assert A == ALPHABET_SIZE and D == NUM_DIHEDRALS
    N = B * S

    # Flattened [-1, V] view; bf16 passes through un-cast (MXU-native).
    x = internal_representation.reshape(N, V)
    if cast_to_bf16:
        x = x.astype(jnp.bfloat16)        # halves the dominant HBM read
    elif x.dtype not in (jnp.float32, jnp.bfloat16):
        x = x.astype(jnp.float32)
    w_t = weight.T.astype(x.dtype)                        # (V, A)
    b2 = bias.reshape(1, A).astype(jnp.float32)           # (1, A)

    # Precompute sin/cos once (host/XLA side), transposed + sublane-padded.
    alpha = alphabet.astype(jnp.float32)                  # (A, 3)
    trig = jnp.concatenate(                               # (8, A)
        [jnp.sin(alpha).T, jnp.cos(alpha).T,
         jnp.zeros((TRIG_ROWS - 2 * D, A), jnp.float32)], axis=0)

    # Row-tile sizing: ~2 MiB x-tile per pipeline buffer (amortizes the
    # ~0.35us per-grid-step overhead), 128-aligned, capped at ceil(N/4) so the
    # grid keeps >=4 steps (>=2 per TensorCore on v7x).  For N <= 128 a single
    # block covers the whole array (block dims == full dims, any N allowed).
    if N <= 128:
        tm = N
    else:
        bytes_per_row = V * x.dtype.itemsize
        tm_max = max(128, min(32768,
                              ((2 * 1024 * 1024) // bytes_per_row // 128) * 128))
        tm = max(128, min(tm_max, _round_up(pl.cdiv(N, 4), 128)))
    grid = pl.cdiv(N, tm)

    # No full-array pad: Pallas handles the ragged final block.  Undefined tail
    # rows stay confined to their own output columns, which the masked
    # final-block writeback never stores.
    yx_t = pl.pallas_call(
        dihedral_kernel,
        out_shape=jax.ShapeDtypeStruct((TRIG_ROWS, N), jnp.float32),
        grid_spec=pltpu.PrefetchScalarGridSpec(
            num_scalar_prefetch=0,
            grid=(grid,),
            in_specs=[
                pl.BlockSpec((tm, V), lambda i: (i, 0)),          # x row tile
                pl.BlockSpec((V, A), lambda i: (0, 0)),           # full weight
                pl.BlockSpec((1, A), lambda i: (0, 0)),           # full bias
                pl.BlockSpec((TRIG_ROWS, A), lambda i: (0, 0)),   # full trig
            ],
            out_specs=pl.BlockSpec((TRIG_ROWS, tm), lambda i: (0, i)),
        ),
        compiler_params=pltpu.CompilerParams(
            dimension_semantics=("parallel",)),
    )(x, w_t, b2, trig)

    # TODO(synk): atan2 kept as tiny plain-JAX glue on the compact (3, N)
    # coordinates rather than relying on Mosaic's atan2 lowering.
    dihedral_t = jnp.arctan2(yx_t[:D, :], yx_t[D:2 * D, :])       # (3, N)
    return dihedral_t.T.reshape(B, S, NUM_DIHEDRALS)


def dihedral_reference(internal_representation, alphabet, weight, bias):
    """Pure-JAX mirror of the PyTorch forward for a correctness check."""
    B, S, V = internal_representation.shape
    linear = internal_representation @ weight.T + bias            # [B, S, A]
    flatten = linear.reshape(-1, ALPHABET_SIZE)
    probs = jax.nn.softmax(flatten / 1.0, axis=1)
    y = probs @ jnp.sin(alphabet)
    x = probs @ jnp.cos(alphabet)
    return jnp.arctan2(y, x).reshape(B, S, NUM_DIHEDRALS)


if __name__ == "__main__":
    key = jax.random.PRNGKey(0)
    k1, k2, k3, k4 = jax.random.split(key, 4)

    # Small shapes implied by the module: batch=2, seq=8, num_vocab=32,
    # alphabet_size=60 (forced by the reshape to [-1, 60]).
    B, S, V = 2, 8, 32
    x = jax.random.normal(k1, (B, S, V), dtype=jnp.float32)
    alphabet = jax.random.uniform(
        k2, (ALPHABET_SIZE, NUM_DIHEDRALS), dtype=jnp.float32,
        minval=-jnp.pi, maxval=jnp.pi)

    # Deterministic synthetic Linear parameters (PyTorch-style uniform bound).
    bound = 1.0 / (V ** 0.5)
    weight = jax.random.uniform(k3, (ALPHABET_SIZE, V), dtype=jnp.float32,
                                minval=-bound, maxval=bound)
    bias = jax.random.uniform(k4, (ALPHABET_SIZE,), dtype=jnp.float32,
                              minval=-bound, maxval=bound)

    out = jax.block_until_ready(dihedral_forward(x, alphabet, weight, bias))
    assert out.shape == (B, S, NUM_DIHEDRALS), out.shape
    ref = jax.block_until_ready(dihedral_reference(x, alphabet, weight, bias))
    assert jnp.allclose(out, ref, rtol=2e-3, atol=2e-3), float(
        jnp.max(jnp.abs(out - ref)))

    # Second small, non-tile-aligned case exercising the multi-step grid and
    # the ragged final block (N = 150, tm = 128 -> grid = 2).
    B2, S2 = 3, 50
    x2 = jax.random.normal(k1, (B2, S2, V), dtype=jnp.float32)
    out2 = jax.block_until_ready(dihedral_forward(x2, alphabet, weight, bias))
    assert out2.shape == (B2, S2, NUM_DIHEDRALS), out2.shape
    ref2 = jax.block_until_ready(dihedral_reference(x2, alphabet, weight, bias))
    assert jnp.allclose(out2, ref2, rtol=2e-3, atol=2e-3), float(
        jnp.max(jnp.abs(out2 - ref2)))

    print("KERNEL_OK")
</pallas_src>

<mosaic_0001>
module attributes {stable_mosaic.version = 11 : i64} {
  func.func @dihedral_kernel(%arg0: i32, %arg1: memref<16x32xf32, #tpu.memory_space<vmem>>, %arg2: memref<32x60xf32, #tpu.memory_space<vmem>>, %arg3: memref<1x60xf32, #tpu.memory_space<vmem>>, %arg4: memref<8x60xf32, #tpu.memory_space<vmem>>, %arg5: memref<8x16xf32, #tpu.memory_space<vmem>>) attributes {dimension_semantics = [#tpu.dimension_semantics<parallel>], iteration_bounds = array<i64: 1>, scalar_prefetch = 0 : i64, scratch_operands = 0 : i64, tpu.core_type = #tpu.core_type<tc>, window_params = [{transform_indices = @transform_0, window_bounds = array<i64: 16, 32>}, {pipeline_mode = #tpu.pipeline_mode<synchronous>, transform_indices = @transform_1, window_bounds = array<i64: 32, 60>}, {pipeline_mode = #tpu.pipeline_mode<synchronous>, transform_indices = @transform_2, window_bounds = array<i64: 1, 60>}, {pipeline_mode = #tpu.pipeline_mode<synchronous>, transform_indices = @transform_3, window_bounds = array<i64: 8, 60>}, {transform_indices = @transform_4, window_bounds = array<i64: 8, 16>}]} {
    %c0 = arith.constant 0 : index
    %c0_0 = arith.constant 0 : index
    %0 = vector.load %arg1[%c0, %c0_0] : memref<16x32xf32, #tpu.memory_space<vmem>>, vector<16x32xf32>
    %c0_1 = arith.constant 0 : index
    %c0_2 = arith.constant 0 : index
    %1 = vector.load %arg2[%c0_1, %c0_2] : memref<32x60xf32, #tpu.memory_space<vmem>>, vector<32x60xf32>
    %cst = arith.constant dense<0.000000e+00> : vector<16x60xf32>
    %2 = tpu.matmul %0, %1, %cst {dimension_numbers = #tpu.dot_dimension_numbers<[1], [0], [0], [1], [0, 0, 1, 1], [], []>} : vector<16x32xf32>, vector<32x60xf32>, vector<16x60xf32> -> vector<16x60xf32>
    %c0_3 = arith.constant 0 : index
    %c0_4 = arith.constant 0 : index
    %3 = vector.load %arg3[%c0_3, %c0_4] : memref<1x60xf32, #tpu.memory_space<vmem>>, vector<1x60xf32>
    %4 = vector.broadcast %3 : vector<1x60xf32> to vector<16x60xf32>
    %5 = arith.addf %2, %4 : vector<16x60xf32>
    %cst_5 = arith.constant dense<0xFF800000> : vector<16xf32>
    %6 = vector.multi_reduction <maximumf>, %5, %cst_5 [1] : vector<16x60xf32> to vector<16xf32>
    %7 = vector.shape_cast %6 : vector<16xf32> to vector<16x1xf32>
    %8 = vector.broadcast %7 : vector<16x1xf32> to vector<16x60xf32>
    %9 = arith.subf %5, %8 : vector<16x60xf32>
    %10 = math.exp %9 : vector<16x60xf32>
    %c0_6 = arith.constant 0 : index
    %c0_7 = arith.constant 0 : index
    %11 = vector.load %arg4[%c0_6, %c0_7] : memref<8x60xf32, #tpu.memory_space<vmem>>, vector<8x60xf32>
    %cst_8 = arith.constant dense<0.000000e+00> : vector<8x16xf32>
    %12 = tpu.matmul %11, %10, %cst_8 {dimension_numbers = #tpu.dot_dimension_numbers<[1], [1], [0], [0], [0, 0, 1, 0], [], []>} : vector<8x60xf32>, vector<16x60xf32>, vector<8x16xf32> -> vector<8x16xf32>
    %c0_9 = arith.constant 0 : index
    %c0_10 = arith.constant 0 : index
    %13 = vector.load %arg5[%c0_9, %c0_10] : memref<8x16xf32, #tpu.memory_space<vmem>>, vector<8x16xf32>
    tpu.vector_store %arg5[%c0_9, %c0_10], %12 {strides = array<i32>} : memref<8x16xf32, #tpu.memory_space<vmem>>, vector<8x16xf32>,
    return
  }
  func.func @transform_0(%arg0: i32) -> (i32, i32) {
    %c0_i32 = arith.constant 0 : i32
    %c0_i32_0 = arith.constant 0 : i32
    return %arg0, %c0_i32 : i32, i32
  }
  func.func @transform_1(%arg0: i32) -> (i32, i32) {
    %c0_i32 = arith.constant 0 : i32
    %c0_i32_0 = arith.constant 0 : i32
    %c0_i32_1 = arith.constant 0 : i32
    return %c0_i32, %c0_i32_0 : i32, i32
  }
  func.func @transform_2(%arg0: i32) -> (i32, i32) {
    %c0_i32 = arith.constant 0 : i32
    %c0_i32_0 = arith.constant 0 : i32
    %c0_i32_1 = arith.constant 0 : i32
    return %c0_i32, %c0_i32_0 : i32, i32
  }
  func.func @transform_3(%arg0: i32) -> (i32, i32) {
    %c0_i32 = arith.constant 0 : i32
    %c0_i32_0 = arith.constant 0 : i32
    %c0_i32_1 = arith.constant 0 : i32
    return %c0_i32, %c0_i32_0 : i32, i32
  }
  func.func @transform_4(%arg0: i32) -> (i32, i32) {
    %c0_i32 = arith.constant 0 : i32
    %c0_i32_0 = arith.constant 0 : i32
    return %c0_i32, %arg0 : i32, i32
  }
}

</mosaic_0001>

<bundles_post_ra>
// kernel: tpu_custom_call.1
= control target key start
LH: loop header
LB: loop body
LE: loop exit
PB: predicated region body
PF: predicated region fallthrough
CT: control target
= control target key end

     0   :  { %9 = vsyncpa [#allocation3], 0  ;;  %s339_s0 = inlined_call_operand.hbm [shape: f32[16,32], index: 0, kind: input, shape index: {}]   ;;  %s340_s1 = inlined_call_operand.hbm [shape: f32[32,60], index: 1, kind: input, shape index: {}]   ;;  %s341_s2 = inlined_call_operand.vmem [shape: f32[1,60], index: 2, kind: input, shape index: {}]   ;;  %s342_s3 = inlined_call_operand.hbm [shape: f32[8,60], index: 3, kind: input, shape index: {}]   ;;  %s343_s4 = inlined_call_operand.hbm [shape: f32[8,16], index: 4, kind: output, shape index: {}]  }
   0x1   :  { %10 = vsyncpa [#allocation6], 0 }
   0x2   :  { %11 = vsyncpa [#allocation4], 0  ;;  %s29_s17 = sshll.u32 %s340_s1, 4  ;;  %s288_s18 = smov [#allocation5]   ;;  %s30_s17 = int_to_ptr.hbm [resolvable:$true] %s29_s17 }
   0x3   :  { %s31_s19 = sshll.u32 %s288_s18, 4  ;;  %s16_s22 = sshll.u32 %s339_s0, 4  ;;  %s32_s19 = int_to_ptr.vmem [resolvable:$true] %s31_s19  ;;  %s17_s22 = int_to_ptr.hbm [resolvable:$true] %s16_s22 }
   0x4   :  { %s289_s23 = smov 128   ;;  %s290_s24 = smov 8  }
   0x5   :  { %37 = dma.hbm_to_vmem [thread:$0]  %s30_s17, 512, %s32_s19, [#allocation6], %s289_s23, %s289_s23, %s290_s24  }
   0x6   :  { %s291_s25 = smov [#allocation2]   ;;  %s45_s29 = sshll.u32 %s342_s3, 4  ;;  %s46_s29 = int_to_ptr.hbm [resolvable:$true] %s45_s29 }
   0x7   :  { %s18_s26 = sshll.u32 %s291_s25, 4  ;;  %s292_s1 = smov [#allocation7]   ;;  %s19_s26 = int_to_ptr.vmem [resolvable:$true] %s18_s26 }
   0x8   :  { %24 = dma.hbm_to_vmem [thread:$0]  %s17_s22, 256, %s19_s26, [#allocation3], %s289_s23, %s289_s23, %s290_s24  }
   0x9   :  { %s47_s30 = sshll.u32 %s292_s1, 4  ;;  %s48_s30 = int_to_ptr.vmem [resolvable:$true] %s47_s30 }
   0xa   :  { %50 = dma.hbm_to_vmem [thread:$0]  %s46_s29, 128, %s48_s30, [#allocation6]  }
   0xb   :  { %282 = dma.done.wait [#allocation3], 256  }
   0xc   :  { %283 = vsyncadd [#allocation3], 4294967040 }
   0xd   :  { %284 = dma.done.wait [#allocation6], 640  }
   0xe   :  { %285 = vsyncadd [#allocation6], 4294966656  ;;  %v68_v0 = vld [vmem:[#allocation5 + $0x18] sm:$0xff]  ;;  %v67_v1 = vld [vmem:[#allocation5 + $0x10] sm:$0xff]  ;;  %vm73_vm0 = vcmask 261120   ;;  %vm103_vm1 = vcmask 490496  }
   0xf   :  { %171 = vmatpush.msra.mxu2 %v68_v0  ;;  %92 = vmatpush.msra.mxu0 %v68_v0  ;;  %v66_v2 = vld [vmem:[#allocation5 + $0x8] sm:$0xff]  ;;  %v65_v3 = vld [vmem:[#allocation5] sm:$0xff]  ;;  %v64_v4 = vld [vmem:[#allocation2 + $0x8] sm:$0xff]  ;;  %s155_s8 = sshll.u32 %s343_s4, 4  ;;  %vm146_vm2 = vcmask 130048   ;;  %s156_s8 = int_to_ptr.hbm [resolvable:$true] %s155_s8 }
  0x10   :  { %v63_v5 = vld [vmem:[#allocation2] sm:$0xff]  ;;  %v116_v21 = vld [vmem:[#allocation7] sm:$0xff] }
  0x11   :  { %172 = vmatpush.msra.mxu2 %v67_v1  ;;  %93 = vmatpush.msra.mxu0 %v67_v1  ;;  %v181_v6 = vld [vmem:[%s341_s2] ss:$0 sm:$0xff]  ;;  %s293_s2 = smov [#allocation8]  }
  0x12   :  { %s153_s5 = sshll.u32 %s293_s2, 4  ;;  %s154_s5 = int_to_ptr.vmem [resolvable:$true] %s153_s5 }
  0x13   :  { %173 = vmatpush.msra.mxu2 %v66_v2  ;;  %94 = vmatpush.msra.mxu0 %v66_v2 }
  0x15   :  { %174 = vmatpush.msra.mxu2 %v65_v3  ;;  %95 = vmatpush.msra.mxu0 %v65_v3 }
  0x16   :  { %167 = vmatmul.msk.f32.vlgmr.msra.gmra.mxu2 %vm73_vm0, %v64_v4  ;;  %166 = vmatmul.msk.f32.vlgmr.msra.gmra.mxu0 %vm73_vm0, %v63_v5 }
  0x93   :  { %v97_v9 = vpop.f32.mrf.mxu0 }
  0x94   :  { %v98_v11 = vadd.f32 %v181_v6, %v97_v9 }
  0x96   :  { %v104_v12 = vsel %vm103_vm1, %v98_v11, -inf }
  0x99   :  { %v100_v7 = vpop.f32.mrf.mxu2 }
  0x9a   :  { %v101_v8 = vadd.f32 %v181_v6, %v100_v7 }
  0x9c   :  { %v107_v10 = vsel %vm103_vm1, %v101_v8, -inf }
  0x9d   :  { %108 = vmax.xlane.f32.xlu0 %v107_v10 }
  0xa5   :  { %105 = vmax.xlane.f32.xlu0 %v104_v12 }
 0x110   :  { %v109_v13 = vpop.xlane.xlu0 %108 }
 0x111   :  { %v111_v14 = vsub.f32 %v101_v8, %v109_v13 }
 0x113   :  { %v114_v15 = vmul.f32 1.442695, %v111_v14 }
 0x115   :  { %182 = vpow2.f32 %v114_v15 }
 0x118   :  { %v106_v16 = vpop.xlane.xlu0 %105 }
 0x119   :  { %v110_v17 = vsub.f32 %v98_v11, %v106_v16 }
 0x11b   :  { %v183_v18 = vpop.eup %182  ;;  %v112_v19 = vmul.f32 1.442695, %v110_v17 }
 0x11c   :  { %168 = vmatpush.xpose.msk.msra.mxu1 %vm103_vm1, %v183_v18 }
 0x11d   :  { %184 = vpow2.f32 %v112_v19 }
 0x123   :  { %v185_v20 = vpop.eup %184 }
 0x124   :  { %169 = vmatpush.xpose.msk.msra.mxu1 %vm103_vm1, %v185_v20 }
 0x127   :  { %170 = vmatmul.msk.f32.vlgmr.msra.gmra.mxu1 %vm103_vm1, %v116_v21 }
 0x1a4   :  { %v143_v22 = vpop.f32.mrf.mxu1 }
 0x1a5   :  { %147 = vst.msk [vmem:[#allocation8] sm:$0xff] %vm146_vm2, %v143_v22 }
 0x1a6   :  { %158 = dma.vmem_to_hbm [thread:$0]  %s154_s5, 128, %s156_s8, [#allocation4]  }
 0x1a7   :  { %286 = dma.done.wait [#allocation4], 128  }
 0x1a8   :  { %287 = vsyncadd [#allocation4], 4294967168 }
 0x1a9   :  { %163 = vsyncpa [#allocation3], 1 }
 0x1aa   :  { %164 = vsyncpa [#allocation6], 1 }
 0x1ab   :  { %165 = vsyncpa [#allocation4], 1 }

</bundles_post_ra>
